<compile_context>
chip_gen: v7x
topology: tpu7x:2x2x1
jax: 0.10.0
libtpu: 0.0.40
codegen_flags: <defaults>
</compile_context>

<pallas_src>
import functools
import math

import jax
import jax.numpy as jnp
from jax.experimental import pallas as pl
from jax.experimental.pallas import tpu as pltpu

_SUB = 8      # sublane quantum
_LANE = 128   # lane quantum


def _round_up(x: int, m: int) -> int:
    return (x + m - 1) // m * m


def _vmem_limit_bytes() -> int:
    """Chip-aware scoped-VMEM request (≈96 MiB on v5e/v6e, ≈48 MiB on v7x)."""
    cap = 64 * 1024 * 1024
    try:
        cap = int(getattr(pltpu.get_tpu_info(), "vmem_capacity_bytes", cap))
    except Exception:
        pass
    return max(32 * 1024 * 1024, min(int(cap * 0.75), 96 * 1024 * 1024))


def _vmem_estimate(bb, tq, sk_pad, d_in, dh, d_out, in_esz, mm_esz) -> int:
    """Rough VMEM footprint for one grid step (double-buffered blocks included)."""
    dbl = 2
    xq_blk = bb * tq * d_in * in_esz * dbl
    xkv_blk = 2 * bb * sk_pad * d_in * in_esz * dbl
    out_blk = bb * tq * d_out * 4 * dbl
    kv_scr = 2 * bb * sk_pad * dh * mm_esz
    temps = bb * tq * (2 * sk_pad + dh) * 4          # scores + exp + q
    weights = 3 * (d_in * dh * mm_esz + dh * 4)
    return xq_blk + xkv_blk + out_blk + kv_scr + temps + weights


def _pick_bb(B, tq, sk_pad, d_in, dh, d_out, in_esz, mm_esz, rows_cap, budget):
    """Largest divisor of B (no batch padding) that respects row cap and VMEM."""
    bb_cap = min(B, max(1, rows_cap // tq))
    for bb in range(bb_cap, 1, -1):
        if B % bb == 0 and _vmem_estimate(bb, tq, sk_pad, d_in, dh, d_out,
                                          in_esz, mm_esz) <= budget:
            return bb
    return 1


def _attention_head_kernel(xq_ref, xk_ref, xv_ref,
                           wq_ref, bq_ref, wk_ref, bk_ref, wv_ref, bv_ref,
                           o_ref, k_scratch, v_scratch,
                           *, scale: float, sk_valid: int, dim_out: int):
    bb, tq, d_in = xq_ref.shape
    _, skp, _ = xk_ref.shape
    dh = wq_ref.shape[1]
    mm_dtype = wq_ref.dtype        # bf16 when use_bf16_matmul, else f32

    # ---- K/V projections: once per batch block, reused across all q tiles. ----
    @pl.when(pl.program_id(1) == 0)
    def _project_kv():
        xk2 = xk_ref[...].reshape(bb * skp, d_in).astype(mm_dtype)
        xv2 = xv_ref[...].reshape(bb * skp, d_in).astype(mm_dtype)
        k = jnp.dot(xk2, wk_ref[...], preferred_element_type=jnp.float32) + bk_ref[...]
        v = jnp.dot(xv2, wv_ref[...], preferred_element_type=jnp.float32) + bv_ref[...]
        k_scratch[...] = k.reshape(bb, skp, dh).astype(k_scratch.dtype)
        v_scratch[...] = v.reshape(bb, skp, dh).astype(v_scratch.dtype)

    # ---- Q projection for this q tile; 1/sqrt(dim_q) folded into q. ----
    xq2 = xq_ref[...].reshape(bb * tq, d_in).astype(mm_dtype)
    q = ((jnp.dot(xq2, wq_ref[...], preferred_element_type=jnp.float32)
          + bq_ref[...]) * scale).reshape(bb, tq, dh)

    k = k_scratch[...]
    v = v_scratch[...]

    # ---- scores: contract head dims directly (no k.T / XLU transpose pass). ----
    scores = jnp.einsum("bqd,bkd->bqk", q.astype(k.dtype), k,
                        preferred_element_type=jnp.float32)   # (bb, tq, skp)

    if sk_valid != skp:  # static: mask zero-padded key positions
        key_ids = jax.lax.broadcasted_iota(jnp.int32, scores.shape, 2)
        scores = jnp.where(key_ids < sk_valid, scores, jnp.float32(-1e30))

    # ---- Numerically stable softmax; normalization deferred until after PV. ----
    m = jnp.max(scores, axis=-1, keepdims=True)
    e = jnp.exp(scores - m)
    denom = jnp.sum(e, axis=-1, keepdims=True)

    pv = jnp.einsum("bqk,bkd->bqd", e.astype(v.dtype), v,
                    preferred_element_type=jnp.float32)       # (bb, tq, dh)

    # Exact reciprocal keeps parity with the f32 reference softmax; the approx
    # EUP reciprocal (pl.reciprocal(..., approx=True)) caused the previous
    # tolerance failure and is intentionally not used here.
    out = pv[:, :, :dim_out] * (1.0 / denom)
    o_ref[...] = out.astype(o_ref.dtype)


def attention_head(xq, xk, xv, wq, bq, wk, bk, wv, bv, *, use_bf16_matmul=False):
    """AttentionHead forward.

    xq: (B, Sq, dim_in); xk, xv: (B, Sk, dim_in).
    Weights pre-transposed as (dim_in, dim_out) (kernel computes x @ W + b,
    equivalent to nn.Linear's x @ W.T + b); biases are (dim_out,).
    """
    B, Sq, dim_in = xq.shape
    _, Sk, _ = xk.shape
    dim_q = wq.shape[1]
    dim_k = wk.shape[1]
    assert wq.shape[0] == dim_in and wk.shape[0] == dim_in and wv.shape[0] == dim_in
    assert dim_q == dim_k, "q/k head dims must match for the score contraction"

    out_dtype = xq.dtype
    mm_dtype = jnp.bfloat16 if use_bf16_matmul else jnp.float32
    mm_esz = 2 if use_bf16_matmul else 4
    in_esz = jnp.dtype(xq.dtype).itemsize

    # ---- Lane-dense projection width (zero-padded, exact). ----
    dh = _round_up(max(dim_q, dim_k, _LANE), _LANE)

    def pad_w(w, b):
        w = jnp.pad(w, ((0, 0), (0, dh - w.shape[1]))).astype(mm_dtype)
        b2 = jnp.reshape(b, (1, -1)).astype(jnp.float32)
        b2 = jnp.pad(b2, ((0, 0), (0, dh - b2.shape[1])))
        return w, b2

    wq_p, bq_p = pad_w(wq, bq)
    wk_p, bk_p = pad_w(wk, bk)
    wv_p, bv_p = pad_w(wv, bv)

    # ---- Tiling: chip-aware row cap; minimal-pad q tiles; divisor batch blocks. ----
    vmem_limit = _vmem_limit_bytes()
    rows_cap = 512 if vmem_limit >= 64 * 1024 * 1024 else 256
    nq = -(-Sq // rows_cap)                       # number of q tiles
    tq = _round_up(-(-Sq // nq), _SUB)            # minimal sublane-aligned tile
    sq_pad = nq * tq
    sk_pad = _round_up(Sk, _SUB)
    bb = _pick_bb(B, tq, sk_pad, dim_in, dh, dim_k, in_esz, mm_esz,
                  rows_cap, int(vmem_limit * 0.7))

    # ---- Pad sequences only if needed; inputs stay in their native dtype. ----
    if sq_pad != Sq:
        xq = jnp.pad(xq, ((0, 0), (0, sq_pad - Sq), (0, 0)))
    if sk_pad != Sk:
        xk = jnp.pad(xk, ((0, 0), (0, sk_pad - Sk), (0, 0)))
        xv = jnp.pad(xv, ((0, 0), (0, sk_pad - Sk), (0, 0)))

    scale = 1.0 / math.sqrt(float(dim_q))
    grid = (B // bb, nq)   # qi innermost → K/V + weights stay resident per batch block

    kernel = functools.partial(_attention_head_kernel, scale=scale,
                               sk_valid=Sk, dim_out=dim_k)

    # Weights/biases: constant index map → DMA'd once, resident across the grid.
    w_spec = lambda shape: pl.BlockSpec(shape, lambda bi, qi: (0, 0))

    out = pl.pallas_call(
        kernel,
        out_shape=jax.ShapeDtypeStruct((B, sq_pad, dim_k), out_dtype),
        grid_spec=pltpu.PrefetchScalarGridSpec(
            num_scalar_prefetch=0,
            grid=grid,
            in_specs=[
                pl.BlockSpec((bb, tq, dim_in), lambda bi, qi: (bi, qi, 0)),
                pl.BlockSpec((bb, sk_pad, dim_in), lambda bi, qi: (bi, 0, 0)),
                pl.BlockSpec((bb, sk_pad, dim_in), lambda bi, qi: (bi, 0, 0)),
                w_spec((dim_in, dh)), w_spec((1, dh)),
                w_spec((dim_in, dh)), w_spec((1, dh)),
                w_spec((dim_in, dh)), w_spec((1, dh)),
            ],
            out_specs=pl.BlockSpec((bb, tq, dim_k), lambda bi, qi: (bi, qi, 0)),
            scratch_shapes=[pltpu.VMEM((bb, sk_pad, dh), mm_dtype),
                            pltpu.VMEM((bb, sk_pad, dh), mm_dtype)],
        ),
        compiler_params=pltpu.CompilerParams(
            # batch axis parallel (megacore on v7x); q-tile axis must be
            # arbitrary because K/V scratch is carried across it.
            dimension_semantics=("parallel", "arbitrary"),
            vmem_limit_bytes=vmem_limit,
        ),
    )(xq, xk, xv, wq_p, bq_p, wk_p, bk_p, wv_p, bv_p)

    return out if sq_pad == Sq else out[:, :Sq, :]


def attention_head_ref(xq, xk, xv, wq, bq, wk, bk, wv, bv):
    """Pure-JAX reference matching the PyTorch forward exactly."""
    q = xq @ wq + bq
    k = xk @ wk + bk
    v = xv @ wv + bv
    scale = q.shape[-1] ** 0.5
    scores = jnp.einsum("bqd,bkd->bqk", q, k) / scale
    p = jax.nn.softmax(scores, axis=-1)
    return jnp.einsum("bqk,bkd->bqd", p, v)


if __name__ == "__main__":
    # Small shapes consistent with the module: batch=2, seq=8, dim_in=32,
    # dim_q=dim_k=32.
    B, Sq, Sk = 2, 8, 8
    dim_in, dim_q, dim_k = 32, 32, 32

    key = jax.random.PRNGKey(0)
    keys = jax.random.split(key, 9)
    xq = jax.random.normal(keys[0], (B, Sq, dim_in), dtype=jnp.float32)
    xk = jax.random.normal(keys[1], (B, Sk, dim_in), dtype=jnp.float32)
    xv = jax.random.normal(keys[2], (B, Sk, dim_in), dtype=jnp.float32)

    # Deterministic nn.Linear-like init; weights stored as (dim_in, dim_out)
    # (already transposed relative to torch's (out, in)).
    bound = 1.0 / math.sqrt(dim_in)
    wq = jax.random.uniform(keys[3], (dim_in, dim_q), minval=-bound, maxval=bound, dtype=jnp.float32)
    bq = jax.random.uniform(keys[4], (dim_q,), minval=-bound, maxval=bound, dtype=jnp.float32)
    wk = jax.random.uniform(keys[5], (dim_in, dim_k), minval=-bound, maxval=bound, dtype=jnp.float32)
    bk = jax.random.uniform(keys[6], (dim_k,), minval=-bound, maxval=bound, dtype=jnp.float32)
    wv = jax.random.uniform(keys[7], (dim_in, dim_k), minval=-bound, maxval=bound, dtype=jnp.float32)
    bv = jax.random.uniform(keys[8], (dim_k,), minval=-bound, maxval=bound, dtype=jnp.float32)

    out = attention_head(xq, xk, xv, wq, bq, wk, bk, wv, bv)
    out = jax.block_until_ready(out)

    ref = attention_head_ref(xq, xk, xv, wq, bq, wk, bk, wv, bv)
    assert out.shape == (B, Sq, dim_k)
    # All math is exact f32 (no approximate reciprocal), so this passes with
    # large margin; differences are accumulation-order only.
    assert jnp.allclose(out, ref, atol=1e-3, rtol=1e-3), "mismatch vs reference"

    print("KERNEL_OK")
</pallas_src>

<mosaic_0001>
module attributes {stable_mosaic.version = 11 : i64} {
  func.func @_attention_head_kernel(%arg0: i32, %arg1: i32, %arg2: memref<2x8x32xf32, #tpu.memory_space<vmem>>, %arg3: memref<2x8x32xf32, #tpu.memory_space<vmem>>, %arg4: memref<2x8x32xf32, #tpu.memory_space<vmem>>, %arg5: memref<32x128xf32, #tpu.memory_space<vmem>>, %arg6: memref<1x128xf32, #tpu.memory_space<vmem>>, %arg7: memref<32x128xf32, #tpu.memory_space<vmem>>, %arg8: memref<1x128xf32, #tpu.memory_space<vmem>>, %arg9: memref<32x128xf32, #tpu.memory_space<vmem>>, %arg10: memref<1x128xf32, #tpu.memory_space<vmem>>, %arg11: memref<2x8x32xf32, #tpu.memory_space<vmem>>, %arg12: memref<2x8x128xf32, #tpu.memory_space<vmem>>, %arg13: memref<2x8x128xf32, #tpu.memory_space<vmem>>) attributes {dimension_semantics = [#tpu.dimension_semantics<parallel>, #tpu.dimension_semantics<arbitrary>], iteration_bounds = array<i64: 1, 1>, scalar_prefetch = 0 : i64, scratch_operands = 2 : i64, tpu.core_type = #tpu.core_type<tc>, window_params = [{transform_indices = @transform_0, window_bounds = array<i64: 2, 8, 32>}, {transform_indices = @transform_1, window_bounds = array<i64: 2, 8, 32>}, {transform_indices = @transform_2, window_bounds = array<i64: 2, 8, 32>}, {pipeline_mode = #tpu.pipeline_mode<synchronous>, transform_indices = @transform_3, window_bounds = array<i64: 32, 128>}, {pipeline_mode = #tpu.pipeline_mode<synchronous>, transform_indices = @transform_4, window_bounds = array<i64: 1, 128>}, {pipeline_mode = #tpu.pipeline_mode<synchronous>, transform_indices = @transform_5, window_bounds = array<i64: 32, 128>}, {pipeline_mode = #tpu.pipeline_mode<synchronous>, transform_indices = @transform_6, window_bounds = array<i64: 1, 128>}, {pipeline_mode = #tpu.pipeline_mode<synchronous>, transform_indices = @transform_7, window_bounds = array<i64: 32, 128>}, {pipeline_mode = #tpu.pipeline_mode<synchronous>, transform_indices = @transform_8, window_bounds = array<i64: 1, 128>}, {transform_indices = @transform_9, window_bounds = array<i64: 2, 8, 32>}]} {
    %c0_i32 = arith.constant 0 : i32
    %0 = arith.cmpi eq, %arg1, %c0_i32 : i32
    %1 = arith.extui %0 : i1 to i32
    %c0_i32_0 = arith.constant 0 : i32
    %2 = arith.cmpi ne, %1, %c0_i32_0 : i32
    scf.if %2 {
      %c0_22 = arith.constant 0 : index
      %c0_23 = arith.constant 0 : index
      %c0_24 = arith.constant 0 : index
      %30 = vector.load %arg3[%c0_22, %c0_23, %c0_24] : memref<2x8x32xf32, #tpu.memory_space<vmem>>, vector<2x8x32xf32>
      %31 = vector.shape_cast %30 : vector<2x8x32xf32> to vector<16x32xf32>
      %c0_25 = arith.constant 0 : index
      %c0_26 = arith.constant 0 : index
      %c0_27 = arith.constant 0 : index
      %32 = vector.load %arg4[%c0_25, %c0_26, %c0_27] : memref<2x8x32xf32, #tpu.memory_space<vmem>>, vector<2x8x32xf32>
      %33 = vector.shape_cast %32 : vector<2x8x32xf32> to vector<16x32xf32>
      %c0_28 = arith.constant 0 : index
      %c0_29 = arith.constant 0 : index
      %34 = vector.load %arg7[%c0_28, %c0_29] : memref<32x128xf32, #tpu.memory_space<vmem>>, vector<32x128xf32>
      %cst_30 = arith.constant dense<0.000000e+00> : vector<16x128xf32>
      %35 = tpu.matmul %31, %34, %cst_30 {dimension_numbers = #tpu.dot_dimension_numbers<[1], [0], [0], [1], [0, 0, 1, 1], [], []>} : vector<16x32xf32>, vector<32x128xf32>, vector<16x128xf32> -> vector<16x128xf32>
      %c0_31 = arith.constant 0 : index
      %c0_32 = arith.constant 0 : index
      %36 = vector.load %arg8[%c0_31, %c0_32] : memref<1x128xf32, #tpu.memory_space<vmem>>, vector<1x128xf32>
      %37 = vector.broadcast %36 : vector<1x128xf32> to vector<16x128xf32>
      %38 = arith.addf %35, %37 : vector<16x128xf32>
      %c0_33 = arith.constant 0 : index
      %c0_34 = arith.constant 0 : index
      %39 = vector.load %arg9[%c0_33, %c0_34] : memref<32x128xf32, #tpu.memory_space<vmem>>, vector<32x128xf32>
      %cst_35 = arith.constant dense<0.000000e+00> : vector<16x128xf32>
      %40 = tpu.matmul %33, %39, %cst_35 {dimension_numbers = #tpu.dot_dimension_numbers<[1], [0], [0], [1], [0, 0, 1, 1], [], []>} : vector<16x32xf32>, vector<32x128xf32>, vector<16x128xf32> -> vector<16x128xf32>
      %c0_36 = arith.constant 0 : index
      %c0_37 = arith.constant 0 : index
      %41 = vector.load %arg10[%c0_36, %c0_37] : memref<1x128xf32, #tpu.memory_space<vmem>>, vector<1x128xf32>
      %42 = vector.broadcast %41 : vector<1x128xf32> to vector<16x128xf32>
      %43 = arith.addf %40, %42 : vector<16x128xf32>
      %44 = vector.shape_cast %38 : vector<16x128xf32> to vector<2x8x128xf32>
      %c0_38 = arith.constant 0 : index
      %c0_39 = arith.constant 0 : index
      %c0_40 = arith.constant 0 : index
      %45 = vector.load %arg12[%c0_38, %c0_39, %c0_40] : memref<2x8x128xf32, #tpu.memory_space<vmem>>, vector<2x8x128xf32>
      tpu.vector_store %arg12[%c0_38, %c0_39, %c0_40], %44 {strides = array<i32>} : memref<2x8x128xf32, #tpu.memory_space<vmem>>, vector<2x8x128xf32>,
      %46 = vector.shape_cast %43 : vector<16x128xf32> to vector<2x8x128xf32>
      %c0_41 = arith.constant 0 : index
      %c0_42 = arith.constant 0 : index
      %c0_43 = arith.constant 0 : index
      %47 = vector.load %arg13[%c0_41, %c0_42, %c0_43] : memref<2x8x128xf32, #tpu.memory_space<vmem>>, vector<2x8x128xf32>
      tpu.vector_store %arg13[%c0_41, %c0_42, %c0_43], %46 {strides = array<i32>} : memref<2x8x128xf32, #tpu.memory_space<vmem>>, vector<2x8x128xf32>,
    } else {
    }
    %c0 = arith.constant 0 : index
    %c0_1 = arith.constant 0 : index
    %c0_2 = arith.constant 0 : index
    %3 = vector.load %arg2[%c0, %c0_1, %c0_2] : memref<2x8x32xf32, #tpu.memory_space<vmem>>, vector<2x8x32xf32>
    %4 = vector.shape_cast %3 : vector<2x8x32xf32> to vector<16x32xf32>
    %c0_3 = arith.constant 0 : index
    %c0_4 = arith.constant 0 : index
    %5 = vector.load %arg5[%c0_3, %c0_4] : memref<32x128xf32, #tpu.memory_space<vmem>>, vector<32x128xf32>
    %cst = arith.constant dense<0.000000e+00> : vector<16x128xf32>
    %6 = tpu.matmul %4, %5, %cst {dimension_numbers = #tpu.dot_dimension_numbers<[1], [0], [0], [1], [0, 0, 1, 1], [], []>} : vector<16x32xf32>, vector<32x128xf32>, vector<16x128xf32> -> vector<16x128xf32>
    %c0_5 = arith.constant 0 : index
    %c0_6 = arith.constant 0 : index
    %7 = vector.load %arg6[%c0_5, %c0_6] : memref<1x128xf32, #tpu.memory_space<vmem>>, vector<1x128xf32>
    %8 = vector.broadcast %7 : vector<1x128xf32> to vector<16x128xf32>
    %9 = arith.addf %6, %8 : vector<16x128xf32>
    %cst_7 = arith.constant 0.176776692 : f32
    %10 = vector.broadcast %cst_7 : f32 to vector<16x128xf32>
    %11 = arith.mulf %9, %10 : vector<16x128xf32>
    %12 = vector.shape_cast %11 : vector<16x128xf32> to vector<2x8x128xf32>
    %c0_8 = arith.constant 0 : index
    %c0_9 = arith.constant 0 : index
    %c0_10 = arith.constant 0 : index
    %13 = vector.load %arg12[%c0_8, %c0_9, %c0_10] : memref<2x8x128xf32, #tpu.memory_space<vmem>>, vector<2x8x128xf32>
    %c0_11 = arith.constant 0 : index
    %c0_12 = arith.constant 0 : index
    %c0_13 = arith.constant 0 : index
    %14 = vector.load %arg13[%c0_11, %c0_12, %c0_13] : memref<2x8x128xf32, #tpu.memory_space<vmem>>, vector<2x8x128xf32>
    "tpu.trace_start"() <{level = 10 : i32, message = "bqd,bkd->bqk"}> : () -> ()
    %cst_14 = arith.constant dense<0.000000e+00> : vector<2x8x8xf32>
    %15 = tpu.matmul %12, %13, %cst_14 {dimension_numbers = #tpu.dot_dimension_numbers<[2], [2], [1], [1], [0, 0, 0, 1, 1, 1], [0], [0]>} : vector<2x8x128xf32>, vector<2x8x128xf32>, vector<2x8x8xf32> -> vector<2x8x8xf32>
    "tpu.trace_stop"() : () -> ()
    %cst_15 = arith.constant dense<0xFF800000> : vector<2x8xf32>
    %16 = vector.multi_reduction <maximumf>, %15, %cst_15 [2] : vector<2x8x8xf32> to vector<2x8xf32>
    %17 = vector.shape_cast %16 : vector<2x8xf32> to vector<2x8x1xf32>
    %18 = vector.broadcast %17 : vector<2x8x1xf32> to vector<2x8x8xf32>
    %19 = arith.subf %15, %18 : vector<2x8x8xf32>
    %20 = math.exp %19 : vector<2x8x8xf32>
    %cst_16 = arith.constant dense<0.000000e+00> : vector<2x8xf32>
    %21 = vector.multi_reduction <add>, %20, %cst_16 [2] : vector<2x8x8xf32> to vector<2x8xf32>
    %22 = vector.shape_cast %21 : vector<2x8xf32> to vector<2x8x1xf32>
    "tpu.trace_start"() <{level = 10 : i32, message = "bqk,bkd->bqd"}> : () -> ()
    %cst_17 = arith.constant dense<0.000000e+00> : vector<2x8x128xf32>
    %23 = tpu.matmul %20, %14, %cst_17 {dimension_numbers = #tpu.dot_dimension_numbers<[2], [1], [1], [2], [0, 0, 0, 1, 1, 2], [0], [0]>} : vector<2x8x8xf32>, vector<2x8x128xf32>, vector<2x8x128xf32> -> vector<2x8x128xf32>
    "tpu.trace_stop"() : () -> ()
    %24 = vector.extract_strided_slice %23 {offsets = [0, 0, 0], sizes = [2, 8, 32], strides = [1, 1, 1]} : vector<2x8x128xf32> to vector<2x8x32xf32>
    %cst_18 = arith.constant 1.000000e+00 : f32
    %25 = vector.broadcast %cst_18 : f32 to vector<2x8x1xf32>
    %26 = arith.divf %25, %22 : vector<2x8x1xf32>
    %27 = vector.broadcast %26 : vector<2x8x1xf32> to vector<2x8x32xf32>
    %28 = arith.mulf %24, %27 : vector<2x8x32xf32>
    %c0_19 = arith.constant 0 : index
    %c0_20 = arith.constant 0 : index
    %c0_21 = arith.constant 0 : index
    %29 = vector.load %arg11[%c0_19, %c0_20, %c0_21] : memref<2x8x32xf32, #tpu.memory_space<vmem>>, vector<2x8x32xf32>
    tpu.vector_store %arg11[%c0_19, %c0_20, %c0_21], %28 {strides = array<i32>} : memref<2x8x32xf32, #tpu.memory_space<vmem>>, vector<2x8x32xf32>,
    return
  }
  func.func @transform_0(%arg0: i32, %arg1: i32) -> (i32, i32, i32) {
    %c0_i32 = arith.constant 0 : i32
    %c0_i32_0 = arith.constant 0 : i32
    return %arg0, %arg1, %c0_i32 : i32, i32, i32
  }
  func.func @transform_1(%arg0: i32, %arg1: i32) -> (i32, i32, i32) {
    %c0_i32 = arith.constant 0 : i32
    %c0_i32_0 = arith.constant 0 : i32
    %c0_i32_1 = arith.constant 0 : i32
    return %arg0, %c0_i32, %c0_i32_0 : i32, i32, i32
  }
  func.func @transform_2(%arg0: i32, %arg1: i32) -> (i32, i32, i32) {
    %c0_i32 = arith.constant 0 : i32
    %c0_i32_0 = arith.constant 0 : i32
    %c0_i32_1 = arith.constant 0 : i32
    return %arg0, %c0_i32, %c0_i32_0 : i32, i32, i32
  }
  func.func @transform_3(%arg0: i32, %arg1: i32) -> (i32, i32) {
    %c0_i32 = arith.constant 0 : i32
    %c0_i32_0 = arith.constant 0 : i32
    %c0_i32_1 = arith.constant 0 : i32
    return %c0_i32, %c0_i32_0 : i32, i32
  }
  func.func @transform_4(%arg0: i32, %arg1: i32) -> (i32, i32) {
    %c0_i32 = arith.constant 0 : i32
    %c0_i32_0 = arith.constant 0 : i32
    %c0_i32_1 = arith.constant 0 : i32
    return %c0_i32, %c0_i32_0 : i32, i32
  }
  func.func @transform_5(%arg0: i32, %arg1: i32) -> (i32, i32) {
    %c0_i32 = arith.constant 0 : i32
    %c0_i32_0 = arith.constant 0 : i32
    %c0_i32_1 = arith.constant 0 : i32
    return %c0_i32, %c0_i32_0 : i32, i32
  }
  func.func @transform_6(%arg0: i32, %arg1: i32) -> (i32, i32) {
    %c0_i32 = arith.constant 0 : i32
    %c0_i32_0 = arith.constant 0 : i32
    %c0_i32_1 = arith.constant 0 : i32
    return %c0_i32, %c0_i32_0 : i32, i32
  }
  func.func @transform_7(%arg0: i32, %arg1: i32) -> (i32, i32) {
    %c0_i32 = arith.constant 0 : i32
    %c0_i32_0 = arith.constant 0 : i32
    %c0_i32_1 = arith.constant 0 : i32
    return %c0_i32, %c0_i32_0 : i32, i32
  }
  func.func @transform_8(%arg0: i32, %arg1: i32) -> (i32, i32) {
    %c0_i32 = arith.constant 0 : i32
    %c0_i32_0 = arith.constant 0 : i32
    %c0_i32_1 = arith.constant 0 : i32
    return %c0_i32, %c0_i32_0 : i32, i32
  }
  func.func @transform_9(%arg0: i32, %arg1: i32) -> (i32, i32, i32) {
    %c0_i32 = arith.constant 0 : i32
    %c0_i32_0 = arith.constant 0 : i32
    return %arg0, %arg1, %c0_i32 : i32, i32, i32
  }
}

</mosaic_0001>

<bundles_post_ra>
// kernel: tpu_custom_call.1
= control target key start
LH: loop header
LB: loop body
LE: loop exit
PB: predicated region body
PF: predicated region fallthrough
CT: control target
= control target key end

     0   :  { %14 = vsyncpa [#allocation5], 0  ;;  %s1257_s0 = inlined_call_operand.hbm [shape: f32[2,8,32], index: 0, kind: input, shape index: {}]   ;;  %s1258_s1 = inlined_call_operand.hbm [shape: f32[2,8,32], index: 1, kind: input, shape index: {}]   ;;  %s1259_s2 = inlined_call_operand.hbm [shape: f32[2,8,32], index: 2, kind: input, shape index: {}]   ;;  %s1260_s3 = inlined_call_operand.hbm [shape: f32[32,128], index: 3, kind: input, shape index: {}]   ;;  %s1261_s4 = inlined_call_operand.vmem [shape: f32[1,128], index: 4, kind: input, shape index: {}]   ;;  %s1262_s5 = inlined_call_operand.hbm [shape: f32[32,128], index: 5, kind: input, shape index: {}]   ;;  %s1263_s6 = inlined_call_operand.vmem [shape: f32[1,128], index: 6, kind: input, shape index: {}]   ;;  %s1264_s7 = inlined_call_operand.hbm [shape: f32[32,128], index: 7, kind: input, shape index: {}]   ;;  %s1265_s8 = inlined_call_operand.vmem [shape: f32[1,128], index: 8, kind: input, shape index: {}]   ;;  %s1266_s9 = inlined_call_operand.hbm [shape: f32[2,8,32], index: 9, kind: output, shape index: {}]  }
   0x1   :  { %15 = vsyncpa [#allocation8], 0 }
   0x2   :  { %16 = vsyncpa [#allocation11], 0 }
   0x3   :  { %17 = vsyncpa [#allocation14], 0 }
   0x4   :  { %18 = vsyncpa [#allocation6], 0  ;;  %s1043_s30 = smov [#allocation7]   ;;  %s1044_s11 = smov [#allocation10]  }
   0x5   :  { %s36_s10 = sshll.u32 %s1043_s30, 4  ;;  %s60_s12 = sshll.u32 %s1044_s11, 4  ;;  %s37_s10 = int_to_ptr.vmem [resolvable:$true] %s36_s10  ;;  %s1104_s12 = int_to_ptr.vmem [resolvable:$true] %s60_s12 }
   0x6   :  { %s879_s15 = scalar_lea.hbm %s1258_s1, 256 }
   0x7   :  { %p880_p0 = scmp.ne.s32.totalorder %s1258_s1, %s879_s15  ;;  %p883_p1 = scmp.lt.u32.totalorder %s879_s15, %s1258_s1 }
   0x9   :  { %p885_p2 = pnand %p883_p1, %p880_p0 }
   0xb   :  { %888 = shalt.err (!%p885_p2)
}
   0xc   :  { %s889_s20 = scalar_lea.vmem %s37_s10, 256  ;;  %p894_p4 = scmp.lt.s32.totalorder %s37_s10, %s37_s10 }
   0xd   :  { %p890_p3 = scmp.ne.s32.totalorder %s37_s10, %s889_s20  ;;  %p895_p5 = scmp.lt.s32.totalorder %s889_s20, %s889_s20 }
   0xf   :  { %p896_p6 = por %p895_p5, %p894_p4 }
  0x11   :  { %p897_p7 = pnand %p896_p6, %p890_p3 }
  0x13   :  { %900 = shalt.err (!%p897_p7)
}
  0x14   :  { %s1045_s21 = smov 128   ;;  %s1046_s22 = smov 8  }
  0x15   :  { %42 = dma.hbm_to_vmem [thread:$0]  %s1258_s1, 256, %s37_s10, [#allocation8], %s1045_s21, %s1045_s21, %s1046_s22  }
  0x16   :  { %s901_s27 = scalar_lea.hbm %s1260_s3, 512 }
  0x17   :  { %p902_p8 = scmp.ne.s32.totalorder %s1260_s3, %s901_s27  ;;  %p905_p9 = scmp.lt.u32.totalorder %s901_s27, %s1260_s3 }
  0x19   :  { %p907_p10 = pnand %p905_p9, %p902_p8 }
  0x1b   :  { %910 = shalt.err (!%p907_p10)
}
  0x1c   :  { %s911_s13 = scalar_lea.vmem %s1104_s12, 512  ;;  %p916_p12 = scmp.lt.s32.totalorder %s1104_s12, %s1104_s12 }
  0x1d   :  { %p912_p11 = scmp.ne.s32.totalorder %s1104_s12, %s911_s13  ;;  %p917_p13 = scmp.lt.s32.totalorder %s911_s13, %s911_s13 }
  0x1f   :  { %p918_p0 = por %p917_p13, %p916_p12 }
  0x21   :  { %p919_p1 = pnand %p918_p0, %p912_p11 }
  0x23   :  { %922 = shalt.err (!%p919_p1)
}
  0x24   :  { %66 = dma.hbm_to_vmem [thread:$0]  %s1260_s3, 512, %s1104_s12, [#allocation11], %s1045_s21, %s1045_s21, %s1046_s22  }
  0x25   :  { %s1047_s14 = smov [#allocation4]   ;;  %s1048_s16 = smov [#allocation9]  }
  0x26   :  { %s24_s15 = sshll.u32 %s1047_s14, 4  ;;  %s48_s17 = sshll.u32 %s1048_s16, 4  ;;  %s25_s15 = int_to_ptr.vmem [resolvable:$true] %s24_s15  ;;  %s1141_s17 = int_to_ptr.vmem [resolvable:$true] %s48_s17 }
  0x27   :  { %s923_s20 = scalar_lea.hbm %s1257_s0, 256 }
  0x28   :  { %p924_p2 = scmp.ne.s32.totalorder %s1257_s0, %s923_s20  ;;  %p927_p3 = scmp.lt.u32.totalorder %s923_s20, %s1257_s0 }
  0x2a   :  { %p929_p4 = pnand %p927_p3, %p924_p2 }
  0x2c   :  { %932 = shalt.err (!%p929_p4)
}
  0x2d   :  { %s933_s3 = scalar_lea.vmem %s25_s15, 256  ;;  %p938_p6 = scmp.lt.s32.totalorder %s25_s15, %s25_s15 }
  0x2e   :  { %p934_p5 = scmp.ne.s32.totalorder %s25_s15, %s933_s3  ;;  %p939_p7 = scmp.lt.s32.totalorder %s933_s3, %s933_s3 }
  0x30   :  { %p940_p8 = por %p939_p7, %p938_p6 }
  0x32   :  { %p941_p9 = pnand %p940_p8, %p934_p5 }
  0x34   :  { %944 = shalt.err (!%p941_p9)
}
  0x35   :  { %30 = dma.hbm_to_vmem [thread:$0]  %s1257_s0, 256, %s25_s15, [#allocation5], %s1045_s21, %s1045_s21, %s1046_s22  }
  0x36   :  { %s945_s30 = scalar_lea.hbm %s1259_s2, 256 }
  0x37   :  { %p946_p10 = scmp.ne.s32.totalorder %s1259_s2, %s945_s30  ;;  %p949_p11 = scmp.lt.u32.totalorder %s945_s30, %s1259_s2 }
  0x39   :  { %p951_p12 = pnand %p949_p11, %p946_p10 }
  0x3b   :  { %954 = shalt.err (!%p951_p12)
}
  0x3c   :  { %s955_s14 = scalar_lea.vmem %s1141_s17, 256  ;;  %p960_p0 = scmp.lt.s32.totalorder %s1141_s17, %s1141_s17 }
  0x3d   :  { %p956_p13 = scmp.ne.s32.totalorder %s1141_s17, %s955_s14  ;;  %p961_p1 = scmp.lt.s32.totalorder %s955_s14, %s955_s14 }
  0x3f   :  { %p962_p2 = por %p961_p1, %p960_p0 }
  0x41   :  { %p963_p3 = pnand %p962_p2, %p956_p13 }
  0x43   :  { %966 = shalt.err (!%p963_p3)
}
  0x44   :  { %54 = dma.hbm_to_vmem [thread:$0]  %s1259_s2, 256, %s1141_s17, [#allocation8], %s1045_s21, %s1045_s21, %s1046_s22  }
  0x45   :  { %s1049_s16 = smov [#allocation12]   ;;  %s1050_s19 = smov [#allocation13]  }
  0x46   :  { %s74_s18 = sshll.u32 %s1049_s16, 4  ;;  %s88_s20 = sshll.u32 %s1050_s19, 4  ;;  %s75_s18 = int_to_ptr.vmem [resolvable:$true] %s74_s18  ;;  %s1178_s20 = int_to_ptr.vmem [resolvable:$true] %s88_s20 }
  0x47   :  { %s967_s25 = scalar_lea.hbm %s1262_s5, 512 }
  0x48   :  { %p968_p4 = scmp.ne.s32.totalorder %s1262_s5, %s967_s25  ;;  %p971_p5 = scmp.lt.u32.totalorder %s967_s25, %s1262_s5 }
  0x4a   :  { %p973_p6 = pnand %p971_p5, %p968_p4 }
  0x4c   :  { %976 = shalt.err (!%p973_p6)
}
  0x4d   :  { %s977_s2 = scalar_lea.vmem %s75_s18, 512  ;;  %p982_p8 = scmp.lt.s32.totalorder %s75_s18, %s75_s18 }
  0x4e   :  { %p978_p7 = scmp.ne.s32.totalorder %s75_s18, %s977_s2  ;;  %p983_p9 = scmp.lt.s32.totalorder %s977_s2, %s977_s2 }
  0x50   :  { %p984_p10 = por %p983_p9, %p982_p8 }
  0x52   :  { %p985_p11 = pnand %p984_p10, %p978_p7 }
  0x54   :  { %988 = shalt.err (!%p985_p11)
}
  0x55   :  { %80 = dma.hbm_to_vmem [thread:$0]  %s1262_s5, 512, %s75_s18, [#allocation11], %s1045_s21, %s1045_s21, %s1046_s22  }
  0x56   :  { %s989_s11 = scalar_lea.hbm %s1264_s7, 512 }
  0x57   :  { %p990_p12 = scmp.ne.s32.totalorder %s1264_s7, %s989_s11  ;;  %p993_p13 = scmp.lt.u32.totalorder %s989_s11, %s1264_s7 }
  0x59   :  { %p995_p0 = pnand %p993_p13, %p990_p12 }
  0x5b   :  { %998 = shalt.err (!%p995_p0)
}
  0x5c   :  { %s999_s0 = scalar_lea.vmem %s1178_s20, 512  ;;  %p1004_p2 = scmp.lt.s32.totalorder %s1178_s20, %s1178_s20 }
  0x5d   :  { %p1000_p1 = scmp.ne.s32.totalorder %s1178_s20, %s999_s0  ;;  %p1005_p3 = scmp.lt.s32.totalorder %s999_s0, %s999_s0 }
  0x5f   :  { %p1006_p4 = por %p1005_p3, %p1004_p2 }
  0x61   :  { %p1007_p5 = pnand %p1006_p4, %p1000_p1 }
  0x63   :  { %1010 = shalt.err (!%p1007_p5)
}
  0x64   :  { %94 = dma.hbm_to_vmem [thread:$0]  %s1264_s7, 512, %s1178_s20, [#allocation14], %s1045_s21, %s1045_s21, %s1046_s22  }
  0x65   :  { %1033 = dma.done.wait [#allocation5], 256  }
  0x66   :  { %1034 = vsyncadd [#allocation5], 4294967040 }
  0x67   :  { %1035 = dma.done.wait [#allocation8], 512  }
  0x68   :  { %1036 = vsyncadd [#allocation8], 4294966784 }
  0x69   :  { %1037 = dma.done.wait [#allocation11], 1024  }
  0x6a   :  { %1038 = vsyncadd [#allocation11], 4294966272 }
  0x6b   :  { %1039 = dma.done.wait [#allocation14], 512  }
  0x6c   :  { %1040 = vsyncadd [#allocation14], 4294966784  ;;  %vm134_vm0 = vcmask 261120   ;;  %v123_v0 = vld [vmem:[#allocation12] sm:$0xff]  ;;  %v124_v1 = vld [vmem:[#allocation12 + $0x8] sm:$0xff]  ;;  %v1051_v24 = vmov 0.0  }
  0x6d   :  { %v125_v2 = vld [vmem:[#allocation12 + $0x10] sm:$0xff]  ;;  %v836_v3 = vpack.c.bf16 %v124_v1, %v123_v0  ;;  %v126_v4 = vld [vmem:[#allocation12 + $0x18] sm:$0xff]  ;;  %v119_v5 = vld [vmem:[#allocation7] sm:$0xff]  ;;  %vm1052_vm1 = vmmov 0   ;;  %vm553_vm2 = vcmask 64512  }
  0x6e   :  { %v840_v6 = vpack.c.bf16 %v126_v4, %v125_v2  ;;  %791 = vmatprep.mubr.msk.f32.mxu0 %vm134_vm0, %v119_v5  ;;  %v314_v7 = vld [vmem:[#allocation10] sm:$0xff]  ;;  %v315_v8 = vld [vmem:[#allocation10 + $0x8] sm:$0xff]  ;;  %v218_v11 = vld [vmem:[#allocation13 + $0x10] sm:$0xff] }
  0x6f   :  { %837 = vmatprep.subr.bf16.mxu0 %v836_v3  ;;  %v216_v9 = vld [vmem:[#allocation13] sm:$0xff]  ;;  %v217_v10 = vld [vmem:[#allocation13 + $0x8] sm:$0xff]  ;;  %v852_v12 = vpack.c.bf16 %v315_v8, %v314_v7  ;;  %v219_v14 = vld [vmem:[#allocation13 + $0x18] sm:$0xff] }
  0x70   :  { %839 = vmatpush3.bf16.msra.mxu0 %v836_v3  ;;  %v844_v13 = vpack.c.bf16 %v217_v10, %v216_v9  ;;  %v316_v15 = vld [vmem:[#allocation10 + $0x10] sm:$0xff]  ;;  %v317_v16 = vld [vmem:[#allocation10 + $0x18] sm:$0xff]  ;;  %v848_v17 = vpack.c.bf16 %v219_v14, %v218_v11  ;;  %v120_v18 = vld [vmem:[#allocation7 + $0x8] sm:$0xff] }
  0x71   :  { %841 = vmatprep.subr.bf16.mxu0 %v840_v6  ;;  %v856_v19 = vpack.c.bf16 %v317_v16, %v316_v15  ;;  %v312_v20 = vld [vmem:[#allocation4] sm:$0xff]  ;;  %v313_v21 = vld [vmem:[#allocation4 + $0x8] sm:$0xff] }
  0x72   :  { %845 = vmatprep.subr.bf16.mxu1 %v844_v13  ;;  %v121_v22 = vld [vmem:[#allocation9] sm:$0xff]  ;;  %v122_v23 = vld [vmem:[#allocation9 + $0x8] sm:$0xff] }
  0x73   :  { %847 = vmatpush3.bf16.msra.mxu1 %v844_v13  ;;  %802 = vmatprep.mubr.msk.f32.mxu1 %vm134_vm0, %v121_v22  ;;  %v746_v25 = vld [vmem:[%s1263_s6] ss:$0 sm:$0xff] }
  0x74   :  { %843 = vmatpush3.bf16.msra.mxu0 %v840_v6  ;;  %849 = vmatprep.subr.bf16.mxu1 %v848_v17  ;;  %v752_v29 = vld [vmem:[%s1261_s4] ss:$0 sm:$0xff]  ;;  %s1053_s4 = smov [#allocation15]  }
  0x75   :  { %853 = vmatprep.subr.bf16.mxu0 %v852_v12  ;;  %v749_v37 = vld [vmem:[%s1265_s8] ss:$0 sm:$0xff]  ;;  %s731_s8 = sshll.u32 %s1053_s4, 4  ;;  %s732_s8 = int_to_ptr.vmem [resolvable:$true] %s731_s8 }
  0x76   :  { %s1011_s23 = scalar_lea.vmem %s732_s8, 256  ;;  %p1016_p7 = scmp.lt.s32.totalorder %s732_s8, %s732_s8 }
  0x77   :  { %792 = vmatmul.mubr.msk.f32.vlgmr.msra.gmra.mrb[0].mxu0 %vm134_vm0, %v120_v18  ;;  %851 = vmatpush3.bf16.msra.mxu1 %v848_v17  ;;  %p1012_p6 = scmp.ne.s32.totalorder %s732_s8, %s1011_s23  ;;  %p1017_p8 = scmp.lt.s32.totalorder %s1011_s23, %s1011_s23 }
  0x78   :  { %855 = vmatpush3.bf16.msra.mxu0 %v852_v12  ;;  %813 = vmatprep.mubr.msk.f32.mxu0 %vm134_vm0, %v312_v20 }
  0x79   :  { %857 = vmatprep.subr.bf16.mxu0 %v856_v19  ;;  %816 = vmatprep.subr.mxu1 %v1051_v24  ;;  %p1018_p9 = por %p1017_p8, %p1016_p7 }
  0x7a   :  { %803 = vmatmul.mubr.msk.f32.vlgmr.msra.gmra.mrb[0].mxu1 %vm134_vm0, %v122_v23 }
  0x7b   :  { %818 = vmatprep.mubr.msk.f32.mxu1 %vm1052_vm1, %v1051_v24  ;;  %p1019_p10 = pnand %p1018_p9, %p1012_p6 }
  0x7c   :  { %859 = vmatpush3.bf16.msra.mxu0 %v856_v19 }
  0x7d   :  { %826 = vmatprep.subr.mxu0 %v1051_v24 }
  0x7f   :  { %814 = vmatmul.mubr.msk.f32.vlgmr.msra.gmra.mrb[2].mxu0 %vm134_vm0, %v313_v21 }
  0x80   :  { %828 = vmatprep.mubr.msk.f32.mxu0 %vm1052_vm1, %v1051_v24 }
 0x14a   :  { %v793_v26 = vpop.f32.mrb[0].mxu0 }
 0x14b   :  { %v207_v27 = vpop.f32.mrb[1].mxu0  ;;  %v213_v35 = vadd.f32 %v793_v26, %v746_v25 }
 0x14c   :  { %v208_v28 = vadd.f32 %v746_v25, %v207_v27 }
 0x14d   :  { %v804_v38 = vpop.f32.mrb[0].mxu1 }
 0x14e   :  { %817 = vmatpush3.xpose.msra.mxu1 %v208_v28  ;;  %v305_v39 = vadd.f32 %v804_v38, %v749_v37  ;;  %v299_v40 = vpop.f32.mrb[1].mxu1 }
 0x14f   :  { %821 = vmatprep.subr.mxu1 %v1051_v24  ;;  %v300_v41 = vadd.f32 %v749_v37, %v299_v40 }
 0x151   :  { %827 = vmatpush3.msra.mxu0 %v300_v41 }
 0x152   :  { %v815_v30 = vpop.f32.mrb[2].mxu0 }
 0x153   :  { %v398_v31 = vpop.f32.mrb[3].mxu0  ;;  %v404_v33 = vadd.f32 %v815_v30, %v752_v29 }
 0x154   :  { %v399_v32 = vadd.f32 %v752_v29, %v398_v31 }
 0x155   :  { %v408_v36 = vmul.f32 0.17677669, %v404_v33 }
 0x156   :  { %v407_v34 = vmul.f32 0.17677669, %v399_v32 }
 0x158   :  { %819 = vmatmul.mubr.f32.vlgmr.msra.gmra.mrb[2].mxu1 %v407_v34 }
 0x159   :  { %822 = vmatpush3.xpose.msra.mxu1 %v213_v35  ;;  %823 = vmatprep.mubr.msk.f32.mxu1 %vm1052_vm1, %v1051_v24 }
 0x15a   :  { %831 = vmatprep.subr.mxu1 %v1051_v24 }
 0x15c   :  { %824 = vmatmul.mubr.f32.vlgmr.msra.gmra.mrb[4].mxu1 %v408_v36 }
 0x15d   :  { %833 = vmatprep.mubr.msk.f32.mxu1 %vm1052_vm1, %v1051_v24  ;;  %832 = vmatpush3.msra.mxu1 %v305_v39 }
 0x22b   :  { %v479_v42 = vpop.f32.mrb[2].mxu1 }
 0x22c   :  { %v820_v43 = vpop.f32.mrb[3].mxu1  ;;  %v554_v44 = vsel %vm553_vm2, %v479_v42, -inf }
 0x22d   :  { %555 = vmax.xlane.f32.xlu0 %v554_v44 }
 0x22f   :  { %v549_v45 = vpop.f32.mrb[4].mxu1 }
 0x230   :  { %v825_v46 = vpop.f32.mrb[5].mxu1  ;;  %v557_v47 = vsel %vm553_vm2, %v549_v45, -inf }
 0x231   :  { %558 = vmax.xlane.f32.xlu0 %v557_v47 }
 0x2ba   :  { %v556_v48 = vpop.xlane.xlu0 %555 }
 0x2bb   :  { %v560_v49 = vsub.f32 %v479_v42, %v556_v48 }
 0x2bd   :  { %v562_v50 = vmul.f32 1.442695, %v560_v49 }
 0x2be   :  { %v559_v51 = vpop.xlane.xlu0 %558 }
 0x2bf   :  { %871 = vpow2.f32 %v562_v50  ;;  %v561_v52 = vsub.f32 %v549_v45, %v559_v51 }
 0x2c1   :  { %v564_v53 = vmul.f32 1.442695, %v561_v52 }
 0x2c3   :  { %873 = vpow2.f32 %v564_v53 }
 0x2c9   :  { %v872_v54 = vpop.eup %871 }
 0x2ca   :  { %829 = vmatmul.mubr.msk.f32.vlgmr.msra.gmra.mrb[4].mxu0 %vm553_vm2, %v872_v54  ;;  %v566_v55 = vsel %vm553_vm2, %v872_v54, 0.0 }
 0x2cb   :  { %567 = vadd.xlane.f32.xlu1 %v566_v55 }
 0x2cd   :  { %v874_v56 = vpop.eup %873 }
 0x2ce   :  { %834 = vmatmul.mubr.msk.f32.vlgmr.msra.gmra.mrb[6].mxu1 %vm553_vm2, %v874_v56  ;;  %v569_v57 = vsel %vm553_vm2, %v874_v56, 0.0 }
 0x2cf   :  { %570 = vadd.xlane.f32.xlu1 %v569_v57 }
 0x358   :  { %v568_v58 = vpop.xlane.xlu1 %567 }
 0x359   :  { %875 = vrcp.f32 %v568_v58 }
 0x35c   :  { %v571_v59 = vpop.xlane.xlu1 %570 }
 0x35d   :  { %877 = vrcp.f32 %v571_v59 }
 0x363   :  { %v876_v60 = vpop.eup %875 }
 0x367   :  { %v878_v0 = vpop.eup %877 }
 0x39d   :  { %v641_v61 = vpop.f32.mrb[4].mxu0 }
 0x39e   :  { %v722_v62 = vmul.f32 %v876_v60, %v641_v61  ;;  %v830_v63 = vpop.f32.mrb[5].mxu0 }
 0x3a0   :  { %724 = vst.msk [vmem:[#allocation15] sm:$0xff] %vm134_vm0, %v722_v62 }
 0x3a1   :  { %v714_v1 = vpop.f32.mrb[6].mxu1 }
 0x3a2   :  { %v723_v2 = vmul.f32 %v878_v0, %v714_v1  ;;  %v835_v3 = vpop.f32.mrb[7].mxu1 }
 0x3a4   :  { %725 = vst.msk [vmem:[#allocation15 + $0x8] sm:$0xff] %vm134_vm0, %v723_v2 }
 0x3a5   :  { %1022 = shalt.err (!%p1019_p10)
}
 0x3a6   :  { %s1023_s26 = scalar_lea.hbm %s1266_s9, 256 }
 0x3a7   :  { %p1024_p11 = scmp.ne.s32.totalorder %s1266_s9, %s1023_s26  ;;  %p1027_p12 = scmp.lt.u32.totalorder %s1023_s26, %s1266_s9 }
 0x3a9   :  { %p1029_p13 = pnand %p1027_p12, %p1024_p11 }
 0x3ab   :  { %1032 = shalt.err (!%p1029_p13)
}
 0x3ac   :  { %737 = dma.vmem_to_hbm [thread:$0]  %s732_s8, 256, %s1266_s9, [#allocation6], %s1045_s21, %s1045_s21, %s1046_s22  }
 0x3ad   :  { %1041 = dma.done.wait [#allocation6], 256  }
 0x3ae   :  { %1042 = vsyncadd [#allocation6], 4294967040 }
 0x3af   :  { %741 = vsyncpa [#allocation5], 1 }
 0x3b0   :  { %742 = vsyncpa [#allocation8], 1 }
 0x3b1   :  { %743 = vsyncpa [#allocation11], 1 }
 0x3b2   :  { %744 = vsyncpa [#allocation14], 1 }
 0x3b3   :  { %745 = vsyncpa [#allocation6], 1 }

</bundles_post_ra>
